<compile_context>
chip_gen: v5e
topology: v5e:2x2
jax: 0.10.0
libtpu: 0.0.40
codegen_flags: <defaults>
</compile_context>

<pallas_src>
import jax
import jax.numpy as jnp
from jax.experimental import pallas as pl
from jax.experimental.pallas import tpu as pltpu


_NEG_BIG = -1e30  # masks padded d_model columns out of the softmax


def _pos_emb_kernel(g_ref, w_ref, b_ref, o_ref):
    # g_ref: [TN, Lp] (bf16)   w_ref: [Lp, Dp] (bf16, VMEM-resident)
    # b_ref: [1, Dp]  (f32)    o_ref: [TN, Dp] (output dtype)
    y = jnp.dot(g_ref[...], w_ref[...], preferred_element_type=jnp.float32)
    y = y + b_ref[...]                        # bias broadcast; padded cols = -1e30
    m = jnp.max(y, axis=-1, keepdims=True)    # numerically-stable softmax (f32)
    e = jnp.exp(y - m)                        # padded cols -> exp(-huge) == 0
    denom = jnp.sum(e, axis=-1, keepdims=True)
    o_ref[...] = (e * pl.reciprocal(denom, approx=True)).astype(o_ref.dtype)


def _round_up(x, m):
    return ((x + m - 1) // m) * m


def positional_encoding(g, w, b, *, compute_dtype=jnp.bfloat16):
    """g: [B, S, max_len]; w: [d_model, max_len] (torch Linear layout); b: [d_model]."""
    B, S, L = g.shape
    D = w.shape[0]
    N = B * S

    # Lane/MXU-friendly padded minor dims.
    Lp = _round_up(L, 128)
    Dp = _round_up(D, 128)

    # Row-tile size from a ~16 MiB double-buffered budget (fits every
    # generation's scoped-VMEM default; weight/bias residency is tiny extra).
    in_bytes = jnp.dtype(compute_dtype).itemsize
    out_bytes = jnp.dtype(g.dtype).itemsize
    per_row = 2 * (Lp * in_bytes + Dp * out_bytes)        # double-buffered in+out
    budget = 16 * 1024 * 1024
    tn = max(256, min(2048, (budget // per_row) // 256 * 256))
    tn = min(tn, _round_up(N, 256))
    Np = _round_up(N, tn)

    # Pad inputs. Zero-padded rows/K-columns are harmless (sliced off / no-op
    # in the matmul); padded output columns are pushed to -1e30 via the bias.
    g2 = jnp.zeros((Np, Lp), dtype=compute_dtype)
    g2 = g2.at[:N, :L].set(g.reshape(N, L).astype(compute_dtype))

    wt = jnp.zeros((Lp, Dp), dtype=compute_dtype)
    wt = wt.at[:L, :D].set(w.T.astype(compute_dtype))

    b2 = jnp.full((1, Dp), _NEG_BIG, dtype=jnp.float32)
    b2 = b2.at[0, :D].set(b.astype(jnp.float32))

    grid = (Np // tn,)
    cost = pl.CostEstimate(
        flops=2 * Np * Lp * Dp,
        transcendentals=Np * Dp,
        bytes_accessed=(Np * Lp * in_bytes + Lp * Dp * in_bytes
                        + Np * Dp * out_bytes + Dp * 4),
    )

    out = pl.pallas_call(
        _pos_emb_kernel,
        out_shape=jax.ShapeDtypeStruct((Np, Dp), g.dtype),
        grid_spec=pltpu.PrefetchScalarGridSpec(
            num_scalar_prefetch=0,
            grid=grid,
            in_specs=[
                pl.BlockSpec((tn, Lp), lambda i: (i, 0)),   # streamed g rows
                pl.BlockSpec((Lp, Dp), lambda i: (0, 0)),   # resident weight
                pl.BlockSpec((1, Dp), lambda i: (0, 0)),    # resident bias
            ],
            out_specs=pl.BlockSpec((tn, Dp), lambda i: (i, 0)),
        ),
        compiler_params=pltpu.CompilerParams(
            dimension_semantics=("parallel",),   # independent rows -> megacore on v7x
        ),
        cost_estimate=cost,
    )(g2, wt, b2)

    return out[:N, :D].reshape(B, S, D)


def transformer_embedding_forward(p, w, b):
    """p = (tok, g). Returns (tok, pos_emb) matching the PyTorch module (eval mode)."""
    tok, g = p
    pos_emb = positional_encoding(g, w, b)
    return tok, pos_emb


def _reference(p, w, b):
    tok, g = p
    y = jnp.einsum("bsl,dl->bsd", g.astype(jnp.float32), w.astype(jnp.float32)) + b
    return tok, jax.nn.softmax(y, axis=-1)


if __name__ == "__main__":
    # Small, module-consistent shapes.
    B, S = 2, 8
    max_len = 32       # params['max_len']
    d_model = 32       # params['d_model']

    key = jax.random.PRNGKey(0)
    k_tok, k_g, k_w, k_b = jax.random.split(key, 4)

    tok = jax.random.normal(k_tok, (B, S, d_model), dtype=jnp.float32)  # p[0], passthrough
    g = jax.random.normal(k_g, (B, S, max_len), dtype=jnp.float32)      # p[1]

    # Deterministic "parameters" for nn.Linear(max_len, d_model):
    w = jax.random.normal(k_w, (d_model, max_len), dtype=jnp.float32) * 0.1
    b = jax.random.normal(k_b, (d_model,), dtype=jnp.float32) * 0.1

    out_tok, out_pos = transformer_embedding_forward((tok, g), w, b)
    out_pos = jax.block_until_ready(out_pos)
    out_tok = jax.block_until_ready(out_tok)

    ref_tok, ref_pos = _reference((tok, g), w, b)
    assert out_tok.shape == (B, S, d_model)
    assert out_pos.shape == (B, S, d_model)
    assert jnp.allclose(out_tok, ref_tok)
    # bf16 MXU inputs + approx (EUP) reciprocal -> relaxed tolerance; softmax
    # outputs are in [0, 1] so atol dominates.
    assert jnp.allclose(out_pos, ref_pos, atol=3e-3, rtol=3e-2)
    # Rows of a softmax must sum to 1.
    assert jnp.allclose(jnp.sum(out_pos, axis=-1), 1.0, atol=1e-3)

    print("KERNEL_OK")
</pallas_src>

<mosaic_0001>
module attributes {stable_mosaic.version = 11 : i64} {
  func.func @_pos_emb_kernel(%arg0: i32, %arg1: memref<256x128xbf16, #tpu.memory_space<vmem>>, %arg2: memref<128x128xbf16, #tpu.memory_space<vmem>>, %arg3: memref<1x128xf32, #tpu.memory_space<vmem>>, %arg4: memref<256x128xf32, #tpu.memory_space<vmem>>) attributes {dimension_semantics = [#tpu.dimension_semantics<parallel>], iteration_bounds = array<i64: 1>, scalar_prefetch = 0 : i64, scratch_operands = 0 : i64, tpu.core_type = #tpu.core_type<tc>, window_params = [{transform_indices = @transform_0, window_bounds = array<i64: 256, 128>}, {pipeline_mode = #tpu.pipeline_mode<synchronous>, transform_indices = @transform_1, window_bounds = array<i64: 128, 128>}, {pipeline_mode = #tpu.pipeline_mode<synchronous>, transform_indices = @transform_2, window_bounds = array<i64: 1, 128>}, {transform_indices = @transform_3, window_bounds = array<i64: 256, 128>}]} {
    %c0 = arith.constant 0 : index
    %c0_0 = arith.constant 0 : index
    %0 = vector.load %arg1[%c0, %c0_0] : memref<256x128xbf16, #tpu.memory_space<vmem>>, vector<256x128xbf16>
    %c0_1 = arith.constant 0 : index
    %c0_2 = arith.constant 0 : index
    %1 = vector.load %arg2[%c0_1, %c0_2] : memref<128x128xbf16, #tpu.memory_space<vmem>>, vector<128x128xbf16>
    %cst = arith.constant dense<0.000000e+00> : vector<256x128xf32>
    %2 = tpu.matmul %0, %1, %cst {dimension_numbers = #tpu.dot_dimension_numbers<[1], [0], [0], [1], [0, 0, 1, 1], [], []>} : vector<256x128xbf16>, vector<128x128xbf16>, vector<256x128xf32> -> vector<256x128xf32>
    %c0_3 = arith.constant 0 : index
    %c0_4 = arith.constant 0 : index
    %3 = vector.load %arg3[%c0_3, %c0_4] : memref<1x128xf32, #tpu.memory_space<vmem>>, vector<1x128xf32>
    %4 = vector.broadcast %3 : vector<1x128xf32> to vector<256x128xf32>
    %5 = arith.addf %2, %4 : vector<256x128xf32>
    %cst_5 = arith.constant dense<0xFF800000> : vector<256xf32>
    %6 = vector.multi_reduction <maximumf>, %5, %cst_5 [1] : vector<256x128xf32> to vector<256xf32>
    %7 = vector.shape_cast %6 : vector<256xf32> to vector<256x1xf32>
    %8 = vector.broadcast %7 : vector<256x1xf32> to vector<256x128xf32>
    %9 = arith.subf %5, %8 : vector<256x128xf32>
    %10 = math.exp %9 : vector<256x128xf32>
    %cst_6 = arith.constant dense<0.000000e+00> : vector<256xf32>
    %11 = vector.multi_reduction <add>, %10, %cst_6 [1] : vector<256x128xf32> to vector<256xf32>
    %12 = vector.shape_cast %11 : vector<256xf32> to vector<256x1xf32>
    %13 = tpu.reciprocal %12 {approx = true} : vector<256x1xf32> -> vector<256x1xf32>
    %14 = vector.broadcast %13 : vector<256x1xf32> to vector<256x128xf32>
    %15 = arith.mulf %10, %14 : vector<256x128xf32>
    %c0_7 = arith.constant 0 : index
    %c0_8 = arith.constant 0 : index
    %16 = vector.load %arg4[%c0_7, %c0_8] : memref<256x128xf32, #tpu.memory_space<vmem>>, vector<256x128xf32>
    tpu.vector_store %arg4[%c0_7, %c0_8], %15 {strides = array<i32>} : memref<256x128xf32, #tpu.memory_space<vmem>>, vector<256x128xf32>,
    return
  }
  func.func @transform_0(%arg0: i32) -> (i32, i32) {
    %c0_i32 = arith.constant 0 : i32
    %c0_i32_0 = arith.constant 0 : i32
    return %arg0, %c0_i32 : i32, i32
  }
  func.func @transform_1(%arg0: i32) -> (i32, i32) {
    %c0_i32 = arith.constant 0 : i32
    %c0_i32_0 = arith.constant 0 : i32
    %c0_i32_1 = arith.constant 0 : i32
    return %c0_i32, %c0_i32_0 : i32, i32
  }
  func.func @transform_2(%arg0: i32) -> (i32, i32) {
    %c0_i32 = arith.constant 0 : i32
    %c0_i32_0 = arith.constant 0 : i32
    %c0_i32_1 = arith.constant 0 : i32
    return %c0_i32, %c0_i32_0 : i32, i32
  }
  func.func @transform_3(%arg0: i32) -> (i32, i32) {
    %c0_i32 = arith.constant 0 : i32
    %c0_i32_0 = arith.constant 0 : i32
    return %arg0, %c0_i32 : i32, i32
  }
}

</mosaic_0001>

<bundles_post_ra>
// kernel: tpu_custom_call.1
= control target key start
LH: loop header
LB: loop body
LE: loop exit
PB: predicated region body
PF: predicated region fallthrough
CT: control target
= control target key end

     0   :  { %8 = vsyncpa [#allocation3], 0  ;;  %s1359_s0 = inlined_call_operand.hbm [shape: bf16[256,128], index: 0, kind: input, shape index: {}]   ;;  %s1360_s1 = inlined_call_operand.hbm [shape: bf16[128,128], index: 1, kind: input, shape index: {}]   ;;  %s1361_s2 = inlined_call_operand.vmem [shape: f32[1,128], index: 2, kind: input, shape index: {}]   ;;  %s1362_s3 = inlined_call_operand.hbm [shape: f32[256,128], index: 3, kind: output, shape index: {}]  }
   0x1   :  { %9 = vsyncpa [#allocation6], 0 }
   0x2   :  { %10 = vsyncpa [#allocation4], 0  ;;  %s15_s14 = sshll.u32 %s1359_s0, 4  ;;  %s1030_s15 = smov [#allocation2]   ;;  %s16_s14 = int_to_ptr.hbm [resolvable:$true] %s15_s14 }
   0x3   :  { %s17_s16 = sshll.u32 %s1030_s15, 4  ;;  %s28_s19 = sshll.u32 %s1360_s1, 4  ;;  %s18_s16 = int_to_ptr.vmem [resolvable:$true] %s17_s16  ;;  %s29_s19 = int_to_ptr.hbm [resolvable:$true] %s28_s19 }
   0x4   :  { %s1031_s20 = smov 64   ;;  %s1032_s21 = smov 4  }
   0x5   :  { %23 = dma.hbm_to_vmem [thread:$0]  %s16_s14, 2048, %s18_s16, [#allocation3], %s1031_s20, %s1031_s20, %s1032_s21  }
   0x6   :  { %s1033_s22 = smov [#allocation5]  }
   0x7   :  { %s30_s23 = sshll.u32 %s1033_s22, 4  ;;  %s31_s23 = int_to_ptr.vmem [resolvable:$true] %s30_s23 }
   0x8   :  { %36 = dma.hbm_to_vmem [thread:$0]  %s29_s19, 1024, %s31_s23, [#allocation6], %s1031_s20, %s1031_s20, %s1032_s21  }
   0x9   :  { %1024 = dma.done.wait [#allocation3], 2048  }
   0xa   :  { %1025 = vsyncadd [#allocation3], 4294965248 }
   0xb   :  { %1026 = dma.done.wait [#allocation6], 1024  }
   0xc   :  { %1027 = vsyncadd [#allocation6], 4294966272  ;;  %v791_v0 = vld [vmem:[#allocation5 + $0x38] sm:$0xff]  ;;  %v790_v1 = vld [vmem:[#allocation5 + $0x30] sm:$0xff]  ;;  %s658_s27 = sshll.u32 %s1362_s3, 4  ;;  %s1035_s28 = smov 128   ;;  %s659_s27 = int_to_ptr.hbm [resolvable:$true] %s658_s27 }
   0xd   :  { %243 = vmatpush.bf16.msra.mxu0 %v791_v0  ;;  %792 = vmatpush.bf16.msra.mxu1 %v791_v0  ;;  %v789_v2 = vld [vmem:[#allocation5 + $0x28] sm:$0xff]  ;;  %v788_v3 = vld [vmem:[#allocation5 + $0x20] sm:$0xff]  ;;  %v787_v4 = vld [vmem:[#allocation5 + $0x18] sm:$0xff]  ;;  %s1036_s29 = smov 8  }
   0xe   :  { %793 = vmatpush.bf16.msra.mxu2 %v791_v0  ;;  %794 = vmatpush.bf16.msra.mxu3 %v791_v0  ;;  %v786_v5 = vld [vmem:[#allocation5 + $0x10] sm:$0xff]  ;;  %v785_v6 = vld [vmem:[#allocation5 + $0x8] sm:$0xff]  ;;  %v784_v7 = vld [vmem:[#allocation5] sm:$0xff] }
   0xf   :  { %v768_v8 = vld [vmem:[#allocation2] sm:$0xff]  ;;  %v769_v12 = vld [vmem:[#allocation2 + $0x8] sm:$0xff]  ;;  %v770_v16 = vld [vmem:[#allocation2 + $0x10] sm:$0xff] }
  0x10   :  { %v772_v9 = vld [vmem:[#allocation2 + $0x20] sm:$0xff]  ;;  %v773_v13 = vld [vmem:[#allocation2 + $0x28] sm:$0xff]  ;;  %v774_v17 = vld [vmem:[#allocation2 + $0x30] sm:$0xff] }
  0x11   :  { %244 = vmatpush.bf16.msra.mxu0 %v790_v1  ;;  %795 = vmatpush.bf16.msra.mxu1 %v790_v1  ;;  %v776_v10 = vld [vmem:[#allocation2 + $0x40] sm:$0xff]  ;;  %v781_v14 = vld [vmem:[#allocation2 + $0x68] sm:$0xff]  ;;  %v778_v18 = vld [vmem:[#allocation2 + $0x50] sm:$0xff] }
  0x12   :  { %796 = vmatpush.bf16.msra.mxu2 %v790_v1  ;;  %797 = vmatpush.bf16.msra.mxu3 %v790_v1  ;;  %v780_v11 = vld [vmem:[#allocation2 + $0x60] sm:$0xff]  ;;  %v777_v15 = vld [vmem:[#allocation2 + $0x48] sm:$0xff]  ;;  %v782_v19 = vld [vmem:[#allocation2 + $0x70] sm:$0xff] }
  0x13   :  { %v771_v20 = vld [vmem:[#allocation2 + $0x18] sm:$0xff]  ;;  %v1066_v24 = vld [vmem:[%s1361_s2] ss:$0 sm:$0xff]  ;;  %s1034_s2 = smov [#allocation7]  }
  0x14   :  { %v775_v21 = vld [vmem:[#allocation2 + $0x38] sm:$0xff]  ;;  %s656_s24 = sshll.u32 %s1034_s2, 4  ;;  %s657_s24 = int_to_ptr.vmem [resolvable:$true] %s656_s24 }
  0x15   :  { %245 = vmatpush.bf16.msra.mxu0 %v789_v2  ;;  %798 = vmatpush.bf16.msra.mxu1 %v789_v2  ;;  %v779_v22 = vld [vmem:[#allocation2 + $0x58] sm:$0xff] }
  0x16   :  { %799 = vmatpush.bf16.msra.mxu2 %v789_v2  ;;  %800 = vmatpush.bf16.msra.mxu3 %v789_v2  ;;  %v783_v23 = vld [vmem:[#allocation2 + $0x78] sm:$0xff] }
  0x19   :  { %246 = vmatpush.bf16.msra.mxu0 %v788_v3  ;;  %801 = vmatpush.bf16.msra.mxu1 %v788_v3 }
  0x1a   :  { %802 = vmatpush.bf16.msra.mxu2 %v788_v3  ;;  %803 = vmatpush.bf16.msra.mxu3 %v788_v3 }
  0x1d   :  { %247 = vmatpush.bf16.msra.mxu0 %v787_v4  ;;  %804 = vmatpush.bf16.msra.mxu1 %v787_v4 }
  0x1e   :  { %805 = vmatpush.bf16.msra.mxu2 %v787_v4  ;;  %806 = vmatpush.bf16.msra.mxu3 %v787_v4 }
  0x21   :  { %248 = vmatpush.bf16.msra.mxu0 %v786_v5  ;;  %807 = vmatpush.bf16.msra.mxu1 %v786_v5 }
  0x22   :  { %808 = vmatpush.bf16.msra.mxu2 %v786_v5  ;;  %809 = vmatpush.bf16.msra.mxu3 %v786_v5 }
  0x25   :  { %249 = vmatpush.bf16.msra.mxu0 %v785_v6  ;;  %810 = vmatpush.bf16.msra.mxu1 %v785_v6 }
  0x26   :  { %811 = vmatpush.bf16.msra.mxu2 %v785_v6  ;;  %812 = vmatpush.bf16.msra.mxu3 %v785_v6 }
  0x29   :  { %250 = vmatpush.bf16.msra.mxu0 %v784_v7  ;;  %813 = vmatpush.bf16.msra.mxu1 %v784_v7 }
  0x2a   :  { %814 = vmatpush.bf16.msra.mxu2 %v784_v7  ;;  %815 = vmatpush.bf16.msra.mxu3 %v784_v7 }
  0x2c   :  { %251 = vmatmul.bf16.vlgmr.msra.gmra.mxu0 %v768_v8  ;;  %271 = vmatmul.bf16.vlgmr.msra.gmra.mxu1 %v772_v9 }
  0x2d   :  { %291 = vmatmul.bf16.vlgmr.msra.gmra.mxu2 %v776_v10  ;;  %311 = vmatmul.bf16.vlgmr.msra.gmra.mxu3 %v780_v11 }
  0x3c   :  { %256 = vmatmul.bf16.gmra.mxu0 %v769_v12  ;;  %276 = vmatmul.bf16.gmra.mxu1 %v773_v13 }
  0x3d   :  { %316 = vmatmul.bf16.gmra.mxu3 %v781_v14  ;;  %296 = vmatmul.bf16.gmra.mxu2 %v777_v15 }
  0x4c   :  { %261 = vmatmul.bf16.gmra.mxu0 %v770_v16  ;;  %281 = vmatmul.bf16.gmra.mxu1 %v774_v17 }
  0x4d   :  { %301 = vmatmul.bf16.gmra.mxu2 %v778_v18  ;;  %321 = vmatmul.bf16.gmra.mxu3 %v782_v19 }
  0x5c   :  { %266 = vmatmul.bf16.gmra.mxu0 %v771_v20  ;;  %286 = vmatmul.bf16.gmra.mxu1 %v775_v21 }
  0x5d   :  { %306 = vmatmul.bf16.gmra.mxu2 %v779_v22  ;;  %326 = vmatmul.bf16.gmra.mxu3 %v783_v23 }
  0xa9   :  { %v252_v25 = vpop.f32.mrf.mxu0  ;;  %v272_v26 = vpop.f32.mrf.mxu1 }
  0xaa   :  { %v1069_v27 = vadd.f32 %v1066_v24, %v252_v25  ;;  %v1072_v28 = vadd.f32 %v1066_v24, %v272_v26 }
  0xac   :  { %348 = vmax.xlane.f32.xlu2 %v1072_v28  ;;  %332 = vmax.xlane.f32.xlu0 %v1069_v27 }
  0xb0   :  { %v292_v29 = vpop.f32.mrf.mxu2  ;;  %v312_v30 = vpop.f32.mrf.mxu3 }
  0xb1   :  { %v1077_v31 = vadd.f32 %v1066_v24, %v292_v29  ;;  %v254_v32 = vpop.f32.mrf.mxu0  ;;  %v274_v33 = vpop.f32.mrf.mxu1  ;;  %v1080_v34 = vadd.f32 %v1066_v24, %v312_v30 }
  0xb2   :  { %v1091_v39 = vadd.f32 %v1066_v24, %v254_v32  ;;  %v1103_v46 = vadd.f32 %v1066_v24, %v274_v33 }
  0xb3   :  { %364 = vmax.xlane.f32.xlu1 %v1077_v31 }
  0xb4   :  { %380 = vmax.xlane.f32.xlu0 %v1080_v34 }
  0xb8   :  { %v294_v35 = vpop.f32.mrf.mxu2  ;;  %v314_v36 = vpop.f32.mrf.mxu3 }
  0xb9   :  { %v1085_v37 = vadd.f32 %v1066_v24, %v294_v35  ;;  %v1088_v38 = vadd.f32 %v1066_v24, %v314_v36  ;;  %v257_v40 = vpop.f32.mrf.mxu0  ;;  %v277_v41 = vpop.f32.mrf.mxu1 }
  0xba   :  { %v1097_v42 = vadd.f32 %v1066_v24, %v257_v40  ;;  %v1109_v49 = vadd.f32 %v1066_v24, %v277_v41 }
  0xbb   :  { %382 = vmax.xlane.f32.xlu1 %v1088_v38  ;;  %366 = vmax.xlane.f32.xlu2 %v1085_v37 }
  0xbc   :  { %334 = vmax.xlane.f32.xlu0 %v1091_v39 }
  0xc0   :  { %v317_v43 = vpop.f32.mrf.mxu3  ;;  %v297_v44 = vpop.f32.mrf.mxu2 }
  0xc1   :  { %v1100_v45 = vadd.f32 %v1066_v24, %v317_v43  ;;  %v259_v47 = vpop.f32.mrf.mxu0  ;;  %v279_v48 = vpop.f32.mrf.mxu1  ;;  %v1115_v51 = vadd.f32 %v1066_v24, %v297_v44 }
  0xc2   :  { %v1112_v50 = vadd.f32 %v1066_v24, %v279_v48  ;;  %v1124_v56 = vadd.f32 %v1066_v24, %v259_v47 }
  0xc3   :  { %384 = vmax.xlane.f32.xlu2 %v1100_v45  ;;  %336 = vmax.xlane.f32.xlu1 %v1097_v42 }
  0xc4   :  { %350 = vmax.xlane.f32.xlu0 %v1103_v46 }
  0xc8   :  { %v299_v52 = vpop.f32.mrf.mxu2  ;;  %v319_v54 = vpop.f32.mrf.mxu3 }
  0xc9   :  { %v262_v53 = vpop.f32.mrf.mxu0  ;;  %v1127_v57 = vadd.f32 %v1066_v24, %v319_v54  ;;  %v282_v59 = vpop.f32.mrf.mxu1  ;;  %v1139_v62 = vadd.f32 %v1066_v24, %v299_v52 }
  0xca   :  { %v1121_v55 = vadd.f32 %v1066_v24, %v262_v53  ;;  %v1136_v61 = vadd.f32 %v1066_v24, %v282_v59 }
  0xcb   :  { %354 = vmax.xlane.f32.xlu2 %v1112_v50  ;;  %352 = vmax.xlane.f32.xlu1 %v1109_v49 }
  0xcc   :  { %368 = vmax.xlane.f32.xlu0 %v1115_v51 }
  0xd0   :  { %v302_v58 = vpop.f32.mrf.mxu2  ;;  %v322_v63 = vpop.f32.mrf.mxu3 }
  0xd1   :  { %v1133_v60 = vadd.f32 %v1066_v24, %v302_v58  ;;  %v264_v0 = vpop.f32.mrf.mxu0  ;;  %v1145_v2 = vadd.f32 %v1066_v24, %v322_v63  ;;  %v284_v5 = vpop.f32.mrf.mxu1 }
  0xd2   :  { %v1148_v3 = vadd.f32 %v1066_v24, %v264_v0  ;;  %v1163_v10 = vadd.f32 %v1066_v24, %v284_v5 }
  0xd3   :  { %340 = vmax.xlane.f32.xlu2 %v1121_v55  ;;  %338 = vmax.xlane.f32.xlu1 %v1124_v56 }
  0xd4   :  { %386 = vmax.xlane.f32.xlu0 %v1127_v57 }
  0xd8   :  { %v304_v1 = vpop.f32.mrf.mxu2  ;;  %v324_v6 = vpop.f32.mrf.mxu3 }
  0xd9   :  { %v1151_v4 = vadd.f32 %v1066_v24, %v304_v1  ;;  %v267_v7 = vpop.f32.mrf.mxu0  ;;  %v1157_v8 = vadd.f32 %v1066_v24, %v324_v6  ;;  %v287_v12 = vpop.f32.mrf.mxu1 }
  0xda   :  { %v1160_v9 = vadd.f32 %v1066_v24, %v267_v7  ;;  %v1169_v13 = vadd.f32 %v1066_v24, %v287_v12 }
  0xdb   :  { %372 = vmax.xlane.f32.xlu2 %v1133_v60  ;;  %370 = vmax.xlane.f32.xlu1 %v1139_v62 }
  0xdc   :  { %356 = vmax.xlane.f32.xlu0 %v1136_v61 }
  0xe0   :  { %v307_v11 = vpop.f32.mrf.mxu2  ;;  %v327_v15 = vpop.f32.mrf.mxu3 }
  0xe1   :  { %v1172_v14 = vadd.f32 %v1066_v24, %v307_v11  ;;  %v1175_v16 = vadd.f32 %v1066_v24, %v327_v15  ;;  %v269_v18 = vpop.f32.mrf.mxu0  ;;  %v289_v19 = vpop.f32.mrf.mxu1 }
  0xe2   :  { %v1184_v21 = vadd.f32 %v1066_v24, %v269_v18  ;;  %v1187_v22 = vadd.f32 %v1066_v24, %v289_v19 }
  0xe3   :  { %342 = vmax.xlane.f32.xlu2 %v1148_v3  ;;  %388 = vmax.xlane.f32.xlu1 %v1145_v2 }
  0xe4   :  { %374 = vmax.xlane.f32.xlu0 %v1151_v4 }
  0xe8   :  { %v309_v17 = vpop.f32.mrf.mxu2  ;;  %v329_v23 = vpop.f32.mrf.mxu3 }
  0xe9   :  { %v1181_v20 = vadd.f32 %v1066_v24, %v309_v17  ;;  %v1193_v25 = vadd.f32 %v1066_v24, %v329_v23 }
  0xeb   :  { %390 = vmax.xlane.f32.xlu2 %v1157_v8  ;;  %358 = vmax.xlane.f32.xlu1 %v1163_v10 }
  0xec   :  { %344 = vmax.xlane.f32.xlu0 %v1160_v9 }
  0xf3   :  { %360 = vmax.xlane.f32.xlu2 %v1169_v13  ;;  %376 = vmax.xlane.f32.xlu1 %v1172_v14 }
  0xf4   :  { %392 = vmax.xlane.f32.xlu0 %v1175_v16 }
  0xfb   :  { %378 = vmax.xlane.f32.xlu2 %v1181_v20  ;;  %346 = vmax.xlane.f32.xlu1 %v1184_v21 }
  0xfc   :  { %362 = vmax.xlane.f32.xlu0 %v1187_v22 }
 0x103   :  { %394 = vmax.xlane.f32.xlu1 %v1193_v25 }
 0x11f   :  { %v349_v26 = vpop.xlane.xlu2 %348  ;;  %v333_v29 = vpop.xlane.xlu0 %332 }
 0x120   :  { %v404_v30 = vsub.f32 %v1072_v28, %v349_v26  ;;  %v396_v32 = vsub.f32 %v1069_v27, %v333_v29 }
 0x122   :  { %v444_v33 = vmul.f32 1.442695, %v404_v30  ;;  %v428_v35 = vmul.f32 1.442695, %v396_v32 }
 0x124   :  { %824 = vpow2.f32 %v444_v33 }
 0x125   :  { %826 = vpow2.f32 %v428_v35 }
 0x126   :  { %v365_v36 = vpop.xlane.xlu1 %364 }
 0x127   :  { %v412_v40 = vsub.f32 %v1077_v31, %v365_v36  ;;  %v381_v41 = vpop.xlane.xlu0 %380 }
 0x128   :  { %v420_v43 = vsub.f32 %v1080_v34, %v381_v41 }
 0x129   :  { %v460_v24 = vmul.f32 1.442695, %v412_v40 }
 0x12a   :  { %v1200_v44 = vpop.eup %824  ;;  %v476_v47 = vmul.f32 1.442695, %v420_v43 }
 0x12b   :  { %v1202_v48 = vpop.eup %826  ;;  %828 = vpow2.f32 %v460_v24  ;;  %508 = vadd.xlane.f32.xlu1 %v1200_v44 }
 0x12c   :  { %830 = vpow2.f32 %v476_v47  ;;  %492 = vadd.xlane.f32.xlu2 %v1202_v48 }
 0x12e   :  { %v383_v27 = vpop.xlane.xlu1 %382  ;;  %v367_v28 = vpop.xlane.xlu2 %366 }
 0x12f   :  { %v413_v52 = vsub.f32 %v1085_v37, %v367_v28  ;;  %v335_v31 = vpop.xlane.xlu0 %334  ;;  %v421_v63 = vsub.f32 %v1088_v38, %v383_v27 }
 0x130   :  { %v397_v53 = vsub.f32 %v1091_v39, %v335_v31 }
 0x131   :  { %v1208_v34 = vpop.eup %828  ;;  %v462_v54 = vmul.f32 1.442695, %v413_v52  ;;  %v478_v37 = vmul.f32 1.442695, %v421_v63 }
 0x132   :  { %v1210_v58 = vpop.eup %830  ;;  %v430_v59 = vmul.f32 1.442695, %v397_v53  ;;  %524 = vadd.xlane.f32.xlu0 %v1208_v34 }
 0x133   :  { %832 = vpow2.f32 %v462_v54 }
 0x134   :  { %540 = vadd.xlane.f32.xlu2 %v1210_v58  ;;  %834 = vpow2.f32 %v430_v59 }
 0x135   :  { %836 = vpow2.f32 %v478_v37 }
 0x136   :  { %v385_v0 = vpop.xlane.xlu2 %384  ;;  %v337_v1 = vpop.xlane.xlu1 %336 }
 0x137   :  { %v398_v5 = vsub.f32 %v1097_v42, %v337_v1  ;;  %v351_v39 = vpop.xlane.xlu0 %350  ;;  %v422_v38 = vsub.f32 %v1100_v45, %v385_v0 }
 0x138   :  { %v405_v6 = vsub.f32 %v1103_v46, %v351_v39 }
 0x139   :  { %v432_v7 = vmul.f32 1.442695, %v398_v5  ;;  %v1217_v11 = vpop.eup %832  ;;  %v480_v18 = vmul.f32 1.442695, %v422_v38 }
 0x13a   :  { %v446_v12 = vmul.f32 1.442695, %v405_v6  ;;  %v1219_v15 = vpop.eup %834  ;;  %526 = vadd.xlane.f32.xlu1 %v1217_v11 }
 0x13b   :  { %838 = vpow2.f32 %v432_v7  ;;  %494 = vadd.xlane.f32.xlu0 %v1219_v15  ;;  %v1226_v26 = vpop.eup %836 }
 0x13c   :  { %840 = vpow2.f32 %v446_v12 }
 0x13d   :  { %842 = vpow2.f32 %v480_v18 }
 0x13e   :  { %v355_v17 = vpop.xlane.xlu2 %354  ;;  %v353_v42 = vpop.xlane.xlu1 %352 }
 0x13f   :  { %v406_v46 = vsub.f32 %v1109_v49, %v353_v42  ;;  %v369_v19 = vpop.xlane.xlu0 %368  ;;  %v407_v33 = vsub.f32 %v1112_v50, %v355_v17 }
 0x140   :  { %v414_v23 = vsub.f32 %v1115_v51, %v369_v19 }
 0x141   :  { %v448_v29 = vmul.f32 1.442695, %v406_v46  ;;  %v1228_v30 = vpop.eup %838  ;;  %v450_v40 = vmul.f32 1.442695, %v407_v33 }
 0x142   :  { %v464_v45 = vmul.f32 1.442695, %v414_v23  ;;  %v1230_v32 = vpop.eup %840  ;;  %496 = vadd.xlane.f32.xlu1 %v1228_v30 }
 0x143   :  { %844 = vpow2.f32 %v448_v29  ;;  %542 = vadd.xlane.f32.xlu0 %v1226_v26  ;;  %510 = vadd.xlane.f32.xlu2 %v1230_v32  ;;  %v1237_v41 = vpop.eup %842 }
 0x144   :  { %846 = vpow2.f32 %v464_v45 }
 0x145   :  { %848 = vpow2.f32 %v450_v40 }
 0x146   :  { %v341_v49 = vpop.xlane.xlu2 %340  ;;  %v339_v51 = vpop.xlane.xlu1 %338 }
 0x147   :  { %v399_v35 = vsub.f32 %v1124_v56, %v339_v51  ;;  %v387_v36 = vpop.xlane.xlu0 %386  ;;  %v400_v1 = vsub.f32 %v1121_v55, %v341_v49 }
 0x148   :  { %v423_v50 = vsub.f32 %v1127_v57, %v387_v36 }
 0x149   :  { %v434_v43 = vmul.f32 1.442695, %v399_v35  ;;  %v1239_v24 = vpop.eup %844  ;;  %v436_v39 = vmul.f32 1.442695, %v400_v1 }
 0x14a   :  { %v1241_v47 = vpop.eup %846  ;;  %544 = vadd.xlane.f32.xlu1 %v1237_v41  ;;  %v482_v53 = vmul.f32 1.442695, %v423_v50 }
 0x14b   :  { %512 = vadd.xlane.f32.xlu0 %v1239_v24  ;;  %528 = vadd.xlane.f32.xlu2 %v1241_v47  ;;  %850 = vpow2.f32 %v434_v43  ;;  %v1249_v63 = vpop.eup %848 }
 0x14e   :  { %v373_v56 = vpop.xlane.xlu2 %372  ;;  %v371_v27 = vpop.xlane.xlu1 %370 }
 0x14f   :  { %v416_v28 = vsub.f32 %v1133_v60, %v373_v56  ;;  %v415_v52 = vsub.f32 %v1139_v62, %v371_v27  ;;  %v357_v31 = vpop.xlane.xlu0 %356 }
 0x150   :  { %v408_v57 = vsub.f32 %v1136_v61, %v357_v31 }
 0x151   :  { %v468_v54 = vmul.f32 1.442695, %v416_v28  ;;  %v466_v59 = vmul.f32 1.442695, %v415_v52  ;;  %v1251_v0 = vpop.eup %850 }
 0x152   :  { %514 = vadd.xlane.f32.xlu1 %v1249_v63  ;;  %v452_v7 = vmul.f32 1.442695, %v408_v57 }
 0x153   :  { %852 = vpow2.f32 %v468_v54  ;;  %498 = vadd.xlane.f32.xlu2 %v1251_v0 }
 0x154   :  { %854 = vpow2.f32 %v466_v59 }
 0x155   :  { %856 = vpow2.f32 %v482_v53 }
 0x156   :  { %v343_v60 = vpop.xlane.xlu2 %342  ;;  %v389_v62 = vpop.xlane.xlu1 %388 }
 0x157   :  { %v401_v37 = vsub.f32 %v1148_v3, %v343_v60  ;;  %v375_v5 = vpop.xlane.xlu0 %374  ;;  %v424_v55 = vsub.f32 %v1145_v2, %v389_v62 }
 0x158   :  { %v417_v61 = vsub.f32 %v1151_v4, %v375_v5 }
 0x159   :  { %v1258_v6 = vpop.eup %852  ;;  %v438_v12 = vmul.f32 1.442695, %v401_v37  ;;  %v484_v46 = vmul.f32 1.442695, %v424_v55 }
 0x15a   :  { %v1260_v38 = vpop.eup %854  ;;  %532 = vadd.xlane.f32.xlu1 %v1258_v6  ;;  %v470_v23 = vmul.f32 1.442695, %v417_v61 }
 0x15b   :  { %v1262_v17 = vpop.eup %856  ;;  %858 = vpow2.f32 %v438_v12  ;;  %530 = vadd.xlane.f32.xlu0 %v1260_v38 }
 0x15c   :  { %860 = vpow2.f32 %v436_v39  ;;  %546 = vadd.xlane.f32.xlu2 %v1262_v17 }
 0x15d   :  { %862 = vpow2.f32 %v452_v7 }
 0x15e   :  { %v391_v3 = vpop.xlane.xlu2 %390  ;;  %v359_v42 = vpop.xlane.xlu1 %358  ;;  %864 = vpow2.f32 %v484_v46 }
 0x15f   :  { %v345_v18 = vpop.xlane.xlu0 %344  ;;  %v409_v2 = vsub.f32 %v1163_v10, %v359_v42  ;;  %866 = vpow2.f32 %v470_v23  ;;  %v425_v57 = vsub.f32 %v1157_v8, %v391_v3 }
 0x160   :  { %v402_v4 = vsub.f32 %v1160_v9, %v345_v18 }
 0x161   :  { %v1269_v19 = vpop.eup %858  ;;  %v454_v36 = vmul.f32 1.442695, %v409_v2  ;;  %v486_v60 = vmul.f32 1.442695, %v425_v57 }
 0x162   :  { %v1271_v29 = vpop.eup %860  ;;  %502 = vadd.xlane.f32.xlu1 %v1269_v19  ;;  %v440_v40 = vmul.f32 1.442695, %v402_v4 }
 0x163   :  { %v1273_v45 = vpop.eup %862  ;;  %500 = vadd.xlane.f32.xlu0 %v1271_v29 }
 0x164   :  { %516 = vadd.xlane.f32.xlu2 %v1273_v45  ;;  %v1281_v50 = vpop.eup %864 }
 0x165   :  { %v1283_v56 = vpop.eup %866 }
 0x166   :  { %v361_v33 = vpop.xlane.xlu2 %360  ;;  %v377_v49 = vpop.xlane.xlu1 %376 }
 0x167   :  { %v410_v51 = vsub.f32 %v1169_v13, %v361_v33  ;;  %v393_v35 = vpop.xlane.xlu0 %392  ;;  %v418_v10 = vsub.f32 %v1172_v14, %v377_v49 }
 0x169   :  { %v456_v43 = vmul.f32 1.442695, %v410_v51  ;;  %v472_v52 = vmul.f32 1.442695, %v418_v10 }
 0x16b   :  { %868 = vpow2.f32 %v456_v43  ;;  %548 = vadd.xlane.f32.xlu0 %v1281_v50 }
 0x16c   :  { %870 = vpow2.f32 %v454_v36  ;;  %534 = vadd.xlane.f32.xlu2 %v1283_v56 }
 0x16d   :  { %872 = vpow2.f32 %v440_v40 }
 0x16e   :  { %v379_v9 = vpop.xlane.xlu2 %378  ;;  %v347_v27 = vpop.xlane.xlu1 %346 }
 0x16f   :  { %v419_v13 = vsub.f32 %v1181_v20, %v379_v9  ;;  %v363_v28 = vpop.xlane.xlu0 %362  ;;  %v403_v20 = vsub.f32 %v1184_v21, %v347_v27 }
 0x170   :  { %v411_v31 = vsub.f32 %v1187_v22, %v363_v28  ;;  %v426_v22 = vsub.f32 %v1175_v16, %v393_v35 }
 0x171   :  { %v1290_v53 = vpop.eup %868  ;;  %v474_v54 = vmul.f32 1.442695, %v419_v13  ;;  %v442_v62 = vmul.f32 1.442695, %v403_v20 }
 0x172   :  { %v1292_v59 = vpop.eup %870  ;;  %v458_v1 = vmul.f32 1.442695, %v411_v31  ;;  %520 = vadd.xlane.f32.xlu1 %v1290_v53  ;;  %v488_v5 = vmul.f32 1.442695, %v426_v22 }
 0x173   :  { %v1295_v14 = vpop.eup %872  ;;  %874 = vpow2.f32 %v474_v54  ;;  %518 = vadd.xlane.f32.xlu0 %v1292_v59 }
 0x174   :  { %876 = vpow2.f32 %v472_v52  ;;  %504 = vadd.xlane.f32.xlu2 %v1295_v14 }
 0x175   :  { %878 = vpow2.f32 %v458_v1 }
 0x176   :  { %v395_v39 = vpop.xlane.xlu1 %394  ;;  %880 = vpow2.f32 %v486_v60 }
 0x177   :  { %882 = vpow2.f32 %v442_v62  ;;  %v427_v21 = vsub.f32 %v1193_v25, %v395_v39 }
 0x178   :  { %884 = vpow2.f32 %v488_v5 }
 0x179   :  { %v1302_v37 = vpop.eup %874  ;;  %v490_v16 = vmul.f32 1.442695, %v427_v21 }
 0x17a   :  { %v1304_v7 = vpop.eup %876  ;;  %538 = vadd.xlane.f32.xlu1 %v1302_v37 }
 0x17b   :  { %v1307_v8 = vpop.eup %878  ;;  %536 = vadd.xlane.f32.xlu0 %v1304_v7  ;;  %886 = vpow2.f32 %v490_v16 }
 0x17c   :  { %522 = vadd.xlane.f32.xlu2 %v1307_v8  ;;  %v1312_v12 = vpop.eup %880 }
 0x17d   :  { %v1314_v55 = vpop.eup %882 }
 0x17e   :  { %v1317_v61 = vpop.eup %884 }
 0x181   :  { %v1321_v3 = vpop.eup %886 }
 0x182   :  { %550 = vadd.xlane.f32.xlu1 %v1312_v12 }
 0x183   :  { %506 = vadd.xlane.f32.xlu0 %v1314_v55 }
 0x184   :  { %552 = vadd.xlane.f32.xlu2 %v1317_v61 }
 0x18b   :  { %554 = vadd.xlane.f32.xlu0 %v1321_v3 }
 0x19e   :  { %v509_v25 = vpop.xlane.xlu1 %508 }
 0x19f   :  { %888 = vrcp.f32 %v509_v25  ;;  %v493_v42 = vpop.xlane.xlu2 %492 }
 0x1a0   :  { %890 = vrcp.f32 %v493_v42 }
 0x1a5   :  { %v889_v18 = vpop.eup %888  ;;  %v525_v46 = vpop.xlane.xlu0 %524 }
 0x1a6   :  { %v891_v23 = vpop.eup %890  ;;  %v596_v2 = vmul.f32 %v889_v18, %v1200_v44  ;;  %892 = vrcp.f32 %v525_v46 }
 0x1a7   :  { %v588_v4 = vmul.f32 %v891_v23, %v1202_v48  ;;  %v541_v33 = vpop.xlane.xlu2 %540 }
 0x1a8   :  { %628 = vst [vmem:[#allocation7 + $0x40] sm:$0xff] %v596_v2  ;;  %894 = vrcp.f32 %v541_v33 }
 0x1a9   :  { %620 = vst [vmem:[#allocation7] sm:$0xff] %v588_v4 }
 0x1ac   :  { %v893_v49 = vpop.eup %892 }
 0x1ad   :  { %v604_v51 = vmul.f32 %v893_v49, %v1208_v34  ;;  %v527_v36 = vpop.xlane.xlu1 %526 }
 0x1ae   :  { %v895_v35 = vpop.eup %894  ;;  %896 = vrcp.f32 %v527_v36  ;;  %v495_v43 = vpop.xlane.xlu0 %494 }
 0x1af   :  { %636 = vst [vmem:[#allocation7 + $0x80] sm:$0xff] %v604_v51  ;;  %v612_v40 = vmul.f32 %v895_v35, %v1210_v58  ;;  %898 = vrcp.f32 %v495_v43 }
 0x1b1   :  { %644 = vst [vmem:[#allocation7 + $0xc0] sm:$0xff] %v612_v40 }
 0x1b4   :  { %v897_v44 = vpop.eup %896 }
 0x1b5   :  { %v899_v10 = vpop.eup %898  ;;  %v605_v48 = vmul.f32 %v897_v44, %v1217_v11  ;;  %v497_v9 = vpop.xlane.xlu1 %496 }
 0x1b6   :  { %v589_v13 = vmul.f32 %v899_v10, %v1219_v15  ;;  %900 = vrcp.f32 %v497_v9  ;;  %v511_v27 = vpop.xlane.xlu2 %510  ;;  %v543_v28 = vpop.xlane.xlu0 %542 }
 0x1b7   :  { %637 = vst [vmem:[#allocation7 + $0x88] sm:$0xff] %v605_v48  ;;  %902 = vrcp.f32 %v511_v27 }
 0x1b8   :  { %621 = vst [vmem:[#allocation7 + $0x8] sm:$0xff] %v589_v13  ;;  %904 = vrcp.f32 %v543_v28 }
 0x1bc   :  { %v901_v34 = vpop.eup %900 }
 0x1bd   :  { %v903_v58 = vpop.eup %902  ;;  %v590_v52 = vmul.f32 %v901_v34, %v1228_v30  ;;  %v545_v31 = vpop.xlane.xlu1 %544 }
 0x1be   :  { %v905_v54 = vpop.eup %904  ;;  %v597_v1 = vmul.f32 %v903_v58, %v1230_v32  ;;  %906 = vrcp.f32 %v545_v31  ;;  %v529_v11 = vpop.xlane.xlu2 %528 }
 0x1bf   :  { %v513_v57 = vpop.xlane.xlu0 %512  ;;  %622 = vst [vmem:[#allocation7 + $0x10] sm:$0xff] %v590_v52  ;;  %v613_v15 = vmul.f32 %v905_v54, %v1226_v26  ;;  %908 = vrcp.f32 %v529_v11 }
 0x1c0   :  { %629 = vst [vmem:[#allocation7 + $0x48] sm:$0xff] %v597_v1  ;;  %910 = vrcp.f32 %v513_v57 }
 0x1c1   :  { %645 = vst [vmem:[#allocation7 + $0xc8] sm:$0xff] %v613_v15 }
 0x1c4   :  { %v907_v20 = vpop.eup %906 }
 0x1c5   :  { %v909_v22 = vpop.eup %908  ;;  %v614_v60 = vmul.f32 %v907_v20, %v1237_v41  ;;  %v515_v62 = vpop.xlane.xlu1 %514 }
 0x1c6   :  { %v911_v30 = vpop.eup %910  ;;  %v606_v5 = vmul.f32 %v909_v22, %v1241_v47  ;;  %912 = vrcp.f32 %v515_v62  ;;  %v499_v32 = vpop.xlane.xlu2 %498 }
 0x1c7   :  { %646 = vst [vmem:[#allocation7 + $0xd0] sm:$0xff] %v614_v60  ;;  %v598_v39 = vmul.f32 %v911_v30, %v1239_v24  ;;  %914 = vrcp.f32 %v499_v32 }
 0x1c8   :  { %638 = vst [vmem:[#allocation7 + $0x90] sm:$0xff] %v606_v5 }
 0x1c9   :  { %630 = vst [vmem:[#allocation7 + $0x50] sm:$0xff] %v598_v39 }
 0x1cc   :  { %v913_v26 = vpop.eup %912 }
 0x1cd   :  { %v915_v21 = vpop.eup %914  ;;  %v599_v16 = vmul.f32 %v913_v26, %v1249_v63  ;;  %v533_v25 = vpop.xlane.xlu1 %532 }
 0x1ce   :  { %v531_v42 = vpop.xlane.xlu0 %530  ;;  %v591_v41 = vmul.f32 %v915_v21, %v1251_v0  ;;  %916 = vrcp.f32 %v533_v25 }
 0x1cf   :  { %v547_v18 = vpop.xlane.xlu2 %546  ;;  %631 = vst [vmem:[#allocation7 + $0x58] sm:$0xff] %v599_v16  ;;  %918 = vrcp.f32 %v531_v42 }
 0x1d0   :  { %623 = vst [vmem:[#allocation7 + $0x18] sm:$0xff] %v591_v41  ;;  %920 = vrcp.f32 %v547_v18 }
 0x1d4   :  { %v917_v47 = vpop.eup %916 }
 0x1d5   :  { %v919_v46 = vpop.eup %918  ;;  %v608_v24 = vmul.f32 %v917_v47, %v1258_v6  ;;  %v503_v23 = vpop.xlane.xlu1 %502 }
 0x1d6   :  { %v501_v2 = vpop.xlane.xlu0 %500  ;;  %v921_v4 = vpop.eup %920  ;;  %v607_v33 = vmul.f32 %v919_v46, %v1260_v38  ;;  %922 = vrcp.f32 %v503_v23 }
 0x1d7   :  { %v517_v63 = vpop.xlane.xlu2 %516  ;;  %640 = vst [vmem:[#allocation7 + $0xa0] sm:$0xff] %v608_v24  ;;  %v615_v0 = vmul.f32 %v921_v4, %v1262_v17  ;;  %924 = vrcp.f32 %v501_v2 }
 0x1d8   :  { %639 = vst [vmem:[#allocation7 + $0x98] sm:$0xff] %v607_v33  ;;  %926 = vrcp.f32 %v517_v63 }
 0x1d9   :  { %647 = vst [vmem:[#allocation7 + $0xd8] sm:$0xff] %v615_v0 }
 0x1dc   :  { %v923_v49 = vpop.eup %922 }
 0x1dd   :  { %v925_v51 = vpop.eup %924  ;;  %v593_v35 = vmul.f32 %v923_v49, %v1269_v19 }
 0x1de   :  { %v549_v36 = vpop.xlane.xlu0 %548  ;;  %v927_v6 = vpop.eup %926  ;;  %v592_v40 = vmul.f32 %v925_v51, %v1271_v29 }
 0x1df   :  { %928 = vrcp.f32 %v549_v36  ;;  %v535_v43 = vpop.xlane.xlu2 %534  ;;  %625 = vst [vmem:[#allocation7 + $0x28] sm:$0xff] %v593_v35  ;;  %v600_v38 = vmul.f32 %v927_v6, %v1273_v45 }
 0x1e0   :  { %930 = vrcp.f32 %v535_v43  ;;  %624 = vst [vmem:[#allocation7 + $0x20] sm:$0xff] %v592_v40 }
 0x1e1   :  { %632 = vst [vmem:[#allocation7 + $0x60] sm:$0xff] %v600_v38 }
 0x1e5   :  { %v929_v17 = vpop.eup %928  ;;  %v521_v44 = vpop.xlane.xlu1 %520 }
 0x1e6   :  { %v931_v10 = vpop.eup %930  ;;  %v616_v48 = vmul.f32 %v929_v17, %v1281_v50  ;;  %932 = vrcp.f32 %v521_v44  ;;  %v519_v9 = vpop.xlane.xlu0 %518 }
 0x1e7   :  { %v609_v19 = vmul.f32 %v931_v10, %v1283_v56  ;;  %934 = vrcp.f32 %v519_v9  ;;  %v505_v13 = vpop.xlane.xlu2 %504 }
 0x1e8   :  { %648 = vst [vmem:[#allocation7 + $0xe0] sm:$0xff] %v616_v48  ;;  %936 = vrcp.f32 %v505_v13 }
 0x1e9   :  { %641 = vst [vmem:[#allocation7 + $0xa8] sm:$0xff] %v609_v19 }
 0x1ec   :  { %v933_v29 = vpop.eup %932 }
 0x1ed   :  { %v935_v27 = vpop.eup %934  ;;  %v602_v45 = vmul.f32 %v933_v29, %v1290_v53  ;;  %v539_v28 = vpop.xlane.xlu1 %538 }
 0x1ee   :  { %v937_v34 = vpop.eup %936  ;;  %v601_v58 = vmul.f32 %v935_v27, %v1292_v59  ;;  %938 = vrcp.f32 %v539_v28  ;;  %v537_v52 = vpop.xlane.xlu0 %536 }
 0x1ef   :  { %634 = vst [vmem:[#allocation7 + $0x70] sm:$0xff] %v602_v45  ;;  %v594_v50 = vmul.f32 %v937_v34, %v1295_v14  ;;  %940 = vrcp.f32 %v537_v52  ;;  %v523_v56 = vpop.xlane.xlu2 %522 }
 0x1f0   :  { %633 = vst [vmem:[#allocation7 + $0x68] sm:$0xff] %v601_v58  ;;  %942 = vrcp.f32 %v523_v56 }
 0x1f1   :  { %626 = vst [vmem:[#allocation7 + $0x30] sm:$0xff] %v594_v50 }
 0x1f4   :  { %v939_v31 = vpop.eup %938 }
 0x1f5   :  { %v941_v54 = vpop.eup %940  ;;  %v611_v1 = vmul.f32 %v939_v31, %v1302_v37  ;;  %v551_v11 = vpop.xlane.xlu1 %550 }
 0x1f6   :  { %v943_v53 = vpop.eup %942  ;;  %v610_v57 = vmul.f32 %v941_v54, %v1304_v7  ;;  %944 = vrcp.f32 %v551_v11  ;;  %v507_v59 = vpop.xlane.xlu0 %506 }
 0x1f7   :  { %643 = vst [vmem:[#allocation7 + $0xb8] sm:$0xff] %v611_v1  ;;  %v603_v15 = vmul.f32 %v943_v53, %v1307_v8  ;;  %946 = vrcp.f32 %v507_v59  ;;  %v553_v14 = vpop.xlane.xlu2 %552 }
 0x1f8   :  { %642 = vst [vmem:[#allocation7 + $0xb0] sm:$0xff] %v610_v57  ;;  %948 = vrcp.f32 %v553_v14 }
 0x1f9   :  { %635 = vst [vmem:[#allocation7 + $0x78] sm:$0xff] %v603_v15 }
 0x1fc   :  { %v945_v20 = vpop.eup %944 }
 0x1fd   :  { %v947_v22 = vpop.eup %946  ;;  %v617_v60 = vmul.f32 %v945_v20, %v1312_v12 }
 0x1fe   :  { %v949_v62 = vpop.eup %948  ;;  %v595_v37 = vmul.f32 %v947_v22, %v1314_v55  ;;  %v555_v30 = vpop.xlane.xlu0 %554 }
 0x1ff   :  { %649 = vst [vmem:[#allocation7 + $0xe8] sm:$0xff] %v617_v60  ;;  %v618_v7 = vmul.f32 %v949_v62, %v1317_v61  ;;  %950 = vrcp.f32 %v555_v30 }
 0x200   :  { %627 = vst [vmem:[#allocation7 + $0x38] sm:$0xff] %v595_v37 }
 0x201   :  { %650 = vst [vmem:[#allocation7 + $0xf0] sm:$0xff] %v618_v7 }
 0x205   :  { %v951_v8 = vpop.eup %950 }
 0x206   :  { %v619_v12 = vmul.f32 %v951_v8, %v1321_v3 }
 0x208   :  { %651 = vst [vmem:[#allocation7 + $0xf8] sm:$0xff] %v619_v12 }
 0x209   :  { %664 = dma.vmem_to_hbm [thread:$0]  %s657_s24, 4096, %s659_s27, [#allocation4], %s1035_s28, %s1035_s28, %s1036_s29  }
 0x20a   :  { %1028 = dma.done.wait [#allocation4], 4096  }
 0x20b   :  { %1029 = vsyncadd [#allocation4], 4294963200 }
 0x20c   :  { %669 = vsyncpa [#allocation3], 1 }
 0x20d   :  { %670 = vsyncpa [#allocation6], 1 }
 0x20e   :  { %671 = vsyncpa [#allocation4], 1 }

</bundles_post_ra>
